<compile_context>
chip_gen: v7x
topology: tpu7x:2x2x1
jax: 0.10.0
libtpu: 0.0.40
codegen_flags: <defaults>
</compile_context>

<pallas_src>
import functools
import math

import jax
import jax.numpy as jnp
from jax.experimental import pallas as pl
from jax.experimental.pallas import tpu as pltpu


def _round_up(x, m):
    return ((x + m - 1) // m) * m


def value_net_kernel(x_ref, w1_ref, b1_ref, w2_ref, b2_ref, w3_ref, b3_ref, o_ref,
                     *, chunk, compute_dtype, precision):
    """One batch tile. x_ref: (bt, S) batch-major; o_ref: (1, bt) feature-major."""
    bt = o_ref.shape[1]
    n_chunks = bt // chunk

    # Tiny, grid-invariant weights/biases: load once per tile, resident in vregs/VMEM.
    w1 = w1_ref[...]
    w2 = w2_ref[...]
    w3 = w3_ref[...]
    b1 = b1_ref[...]
    b2 = b2_ref[...]
    b3 = b3_ref[0, 0]

    def body(c, carry):
        col = pl.multiple_of(c * chunk, chunk)
        # (chunk, S) slice of the batch-major input tile. Only the matmul operand is
        # cast (bias add / tanh stay f32 - v5e has no bf16 VPU/EUP).
        x = x_ref[pl.ds(col, chunk), :].astype(compute_dtype)

        # Layer 1: W1 @ x.T -> (H, chunk), feature-major (batch on the lane axis).
        h1 = jax.lax.dot_general(
            w1, x, (((1,), (1,)), ((), ())),
            preferred_element_type=jnp.float32, precision=precision)
        h1 = jnp.tanh(h1 + b1)

        # Layer 2: W2 @ h1 -> (H, chunk).
        h2 = jax.lax.dot_general(
            w2, h1.astype(compute_dtype), (((1,), (0,)), ((), ())),
            preferred_element_type=jnp.float32, precision=precision)
        h2 = jnp.tanh(h2 + b2)

        # Layer 3: (1, H) @ (H, chunk) -> lane-dense (1, chunk) output slab.
        out = jax.lax.dot_general(
            w3, h2.astype(compute_dtype), (((1,), (0,)), ((), ())),
            preferred_element_type=jnp.float32, precision=precision)
        o_ref[:, pl.ds(col, chunk)] = out + b3
        return carry

    # Inner loop bounds vreg live ranges ((H, chunk) instead of (H, bt) intermediates)
    # while keeping the big, per-step-overhead-amortizing DMA tile.
    jax.lax.fori_loop(0, n_chunks, body, 0, unroll=True)


def value_network_forward(states, params, *, batch_tile=2048,
                          compute_dtype=jnp.float32, precision=None):
    """states: (B, state_dim) -> (B, 1) float32.

    params are PyTorch-layout: w_i = (out_features, in_features),
    b1/b2 = (hidden, 1), b3 = (1, 1).
    compute_dtype: dtype of the matmul operands (jnp.bfloat16 is the fast path on
    v6e/v7x); accumulation, bias add and tanh are always float32.
    precision: optional lax.Precision for the f32 matmul path (review suggestion).
    """
    w1, b1, w2, b2, w3, b3 = params
    states = jnp.asarray(states)
    if not jnp.issubdtype(states.dtype, jnp.floating):
        states = states.astype(jnp.float32)
    B, S = states.shape
    H = w1.shape[0]

    # Batch tile: multiple of 128 (lane width). Clamp so the grid has >= 2 steps when
    # the batch allows it (v7x megacore only engages with grid >= 2), never below 128.
    bt = max(128, _round_up(batch_tile, 128))
    two_step = max(128, _round_up(pl.cdiv(B, 2), 128))
    bt = min(bt, two_step)
    grid = (pl.cdiv(B, bt),)  # partial trailing tile handled by Pallas masking

    # Inner sub-chunk size for the vreg live-range guard (always divides bt).
    chunk = math.gcd(bt, 512)

    # Matmul-operand dtype: cast the (tiny) weights once in the wrapper; the x tile is
    # cast in-kernel so no extra HBM pass is spent re-materializing `states`.
    wc = lambda w: w.astype(compute_dtype)

    n_w = w1.size + w2.size + w3.size
    n_b = b1.size + b2.size + b3.size
    cost = pl.CostEstimate(
        flops=2 * B * (S * H + H * H + H),
        transcendentals=2 * B * H,
        bytes_accessed=int(states.size * states.dtype.itemsize            # x
                           + B * 4                                        # out
                           + n_w * jnp.dtype(compute_dtype).itemsize      # weights
                           + n_b * 4),                                    # biases
    )

    const = lambda shape: pl.BlockSpec(shape, lambda i: (0, 0))  # grid-invariant block
    kernel = functools.partial(value_net_kernel, chunk=chunk,
                               compute_dtype=compute_dtype, precision=precision)
    out = pl.pallas_call(
        kernel,
        out_shape=jax.ShapeDtypeStruct((1, B), jnp.float32),
        grid=grid,
        in_specs=[
            pl.BlockSpec((bt, S), lambda i: (i, 0)),            # states (batch-major)
            const((H, S)),                                      # w1
            const((H, 1)),                                      # b1
            const((H, H)),                                      # w2
            const((H, 1)),                                      # b2
            const((1, H)),                                      # w3
            pl.BlockSpec(memory_space=pltpu.MemorySpace.SMEM),  # b3 (scalar in SMEM)
        ],
        out_specs=pl.BlockSpec((1, bt), lambda i: (0, i)),      # lane-dense output
        compiler_params=pltpu.CompilerParams(
            dimension_semantics=("parallel",),
        ),
        cost_estimate=cost,
    )(states, wc(w1), b1, wc(w2), b2, wc(w3), b3)

    # (1, B) -> (B, 1) batch-major output expected by the module (tiny copy).
    return out.reshape(B, 1)


def init_params(key, state_dim, hidden_dim=32):
    """Deterministic init mimicking PyTorch nn.Linear default, in (out, in) layout."""
    keys = jax.random.split(key, 6)

    def linear(kw, kb, fan_in, fan_out):
        bound = 1.0 / jnp.sqrt(jnp.float32(fan_in))
        w = jax.random.uniform(kw, (fan_out, fan_in), jnp.float32, -bound, bound)
        b = jax.random.uniform(kb, (fan_out, 1), jnp.float32, -bound, bound)
        return w, b

    w1, b1 = linear(keys[0], keys[1], state_dim, hidden_dim)
    w2, b2 = linear(keys[2], keys[3], hidden_dim, hidden_dim)
    w3, b3 = linear(keys[4], keys[5], hidden_dim, 1)
    return (w1, b1, w2, b2, w3, b3)


def reference_forward(states, params, precision=None):
    w1, b1, w2, b2, w3, b3 = params
    h1 = jnp.tanh(jnp.matmul(states, w1.T, precision=precision) + b1.T)
    h2 = jnp.tanh(jnp.matmul(h1, w2.T, precision=precision) + b2.T)
    return jnp.matmul(h2, w3.T, precision=precision) + b3.T


if __name__ == "__main__":
    key = jax.random.PRNGKey(0)
    k_x, k_p, k_x2 = jax.random.split(key, 3)

    batch = 8
    state_dim = 4
    hidden_dim = 32

    states = jax.random.normal(k_x, (batch, state_dim), dtype=jnp.float32)
    params = init_params(k_p, state_dim, hidden_dim)

    # f32 path, single (partial) tile, no padding/transpose in the wrapper.
    out = jax.block_until_ready(value_network_forward(states, params))
    ref = reference_forward(states, params)
    assert out.shape == (batch, 1)
    assert jnp.allclose(out, ref, atol=1e-4, rtol=1e-4)

    # Multi-tile grid path (grid >= 2, uneven batch -> masked trailing tile).
    batch2 = 300
    states2 = jax.random.normal(k_x2, (batch2, state_dim), dtype=jnp.float32)
    out2 = jax.block_until_ready(
        value_network_forward(states2, params, batch_tile=128)
    )
    ref2 = reference_forward(states2, params)
    assert out2.shape == (batch2, 1)
    assert jnp.allclose(out2, ref2, atol=1e-4, rtol=1e-4)

    # bf16 matmul-operand fast path (v6e/v7x); f32 accumulate/bias/tanh.
    out3 = jax.block_until_ready(
        value_network_forward(states2, params, compute_dtype=jnp.bfloat16)
    )
    assert out3.shape == (batch2, 1)
    assert jnp.allclose(out3, ref2, atol=5e-2, rtol=5e-2)

    print("KERNEL_OK")
</pallas_src>

<mosaic_0001>
module attributes {stable_mosaic.version = 11 : i64} {
  func.func @value_net_kernel(%arg0: i32, %arg1: memref<128x4xf32, #tpu.memory_space<vmem>>, %arg2: memref<32x4xf32, #tpu.memory_space<vmem>>, %arg3: memref<32x1xf32, #tpu.memory_space<vmem>>, %arg4: memref<32x32xf32, #tpu.memory_space<vmem>>, %arg5: memref<32x1xf32, #tpu.memory_space<vmem>>, %arg6: memref<1x32xf32, #tpu.memory_space<vmem>>, %arg7: memref<1x1xf32, #tpu.memory_space<smem>>, %arg8: memref<1x128xf32, #tpu.memory_space<vmem>>) attributes {dimension_semantics = [#tpu.dimension_semantics<parallel>], iteration_bounds = array<i64: 1>, scalar_prefetch = 0 : i64, scratch_operands = 0 : i64, tpu.core_type = #tpu.core_type<tc>, window_params = [{transform_indices = @transform_0, window_bounds = array<i64: 128, 4>}, {pipeline_mode = #tpu.pipeline_mode<synchronous>, transform_indices = @transform_1, window_bounds = array<i64: 32, 4>}, {pipeline_mode = #tpu.pipeline_mode<synchronous>, transform_indices = @transform_2, window_bounds = array<i64: 32, 1>}, {pipeline_mode = #tpu.pipeline_mode<synchronous>, transform_indices = @transform_3, window_bounds = array<i64: 32, 32>}, {pipeline_mode = #tpu.pipeline_mode<synchronous>, transform_indices = @transform_4, window_bounds = array<i64: 32, 1>}, {pipeline_mode = #tpu.pipeline_mode<synchronous>, transform_indices = @transform_5, window_bounds = array<i64: 1, 32>}, {transform_indices = @transform_6, window_bounds = array<i64: 1, 1>}, {transform_indices = @transform_7, window_bounds = array<i64: 1, 128>}]} {
    %c0 = arith.constant 0 : index
    %c0_0 = arith.constant 0 : index
    %0 = vector.load %arg2[%c0, %c0_0] : memref<32x4xf32, #tpu.memory_space<vmem>>, vector<32x4xf32>
    %c0_1 = arith.constant 0 : index
    %c0_2 = arith.constant 0 : index
    %1 = vector.load %arg4[%c0_1, %c0_2] : memref<32x32xf32, #tpu.memory_space<vmem>>, vector<32x32xf32>
    %c0_3 = arith.constant 0 : index
    %c0_4 = arith.constant 0 : index
    %2 = vector.load %arg6[%c0_3, %c0_4] : memref<1x32xf32, #tpu.memory_space<vmem>>, vector<1x32xf32>
    %c0_5 = arith.constant 0 : index
    %c0_6 = arith.constant 0 : index
    %3 = vector.load %arg3[%c0_5, %c0_6] : memref<32x1xf32, #tpu.memory_space<vmem>>, vector<32x1xf32>
    %c0_7 = arith.constant 0 : index
    %c0_8 = arith.constant 0 : index
    %4 = vector.load %arg5[%c0_7, %c0_8] : memref<32x1xf32, #tpu.memory_space<vmem>>, vector<32x1xf32>
    %c0_9 = arith.constant 0 : index
    %c0_10 = arith.constant 0 : index
    %5 = memref.load %arg7[%c0_9, %c0_10] : memref<1x1xf32, #tpu.memory_space<smem>>
    %c0_i32 = arith.constant 0 : i32
    %c128_i32 = arith.constant 128 : i32
    %6 = arith.muli %c0_i32, %c128_i32 : i32
    %7 = tpu.assume_multiple %6, 128 : i32
    %8 = arith.index_cast %7 : i32 to index
    %c0_11 = arith.constant 0 : index
    %9 = vector.load %arg1[%8, %c0_11] : memref<128x4xf32, #tpu.memory_space<vmem>>, vector<128x4xf32>
    %cst = arith.constant dense<0.000000e+00> : vector<32x128xf32>
    %10 = tpu.matmul %0, %9, %cst {dimension_numbers = #tpu.dot_dimension_numbers<[1], [1], [0], [0], [0, 0, 1, 0], [], []>} : vector<32x4xf32>, vector<128x4xf32>, vector<32x128xf32> -> vector<32x128xf32>
    %11 = vector.broadcast %3 : vector<32x1xf32> to vector<32x128xf32>
    %12 = arith.addf %10, %11 : vector<32x128xf32>
    %13 = math.tanh %12 : vector<32x128xf32>
    %cst_12 = arith.constant dense<0.000000e+00> : vector<32x128xf32>
    %14 = tpu.matmul %1, %13, %cst_12 {dimension_numbers = #tpu.dot_dimension_numbers<[1], [0], [0], [1], [0, 0, 1, 1], [], []>} : vector<32x32xf32>, vector<32x128xf32>, vector<32x128xf32> -> vector<32x128xf32>
    %15 = vector.broadcast %4 : vector<32x1xf32> to vector<32x128xf32>
    %16 = arith.addf %14, %15 : vector<32x128xf32>
    %17 = math.tanh %16 : vector<32x128xf32>
    %cst_13 = arith.constant dense<0.000000e+00> : vector<1x128xf32>
    %18 = tpu.matmul %2, %17, %cst_13 {dimension_numbers = #tpu.dot_dimension_numbers<[1], [0], [0], [1], [0, 0, 1, 1], [], []>} : vector<1x32xf32>, vector<32x128xf32>, vector<1x128xf32> -> vector<1x128xf32>
    %19 = vector.broadcast %5 : f32 to vector<1x128xf32>
    %20 = arith.addf %18, %19 : vector<1x128xf32>
    %c0_14 = arith.constant 0 : index
    %21 = arith.index_cast %7 : i32 to index
    %22 = vector.load %arg8[%c0_14, %21] : memref<1x128xf32, #tpu.memory_space<vmem>>, vector<1x128xf32>
    tpu.vector_store %arg8[%c0_14, %21], %20 {strides = array<i32>} : memref<1x128xf32, #tpu.memory_space<vmem>>, vector<1x128xf32>,
    %c1_i32 = arith.constant 1 : i32
    return
  }
  func.func @transform_0(%arg0: i32) -> (i32, i32) {
    %c0_i32 = arith.constant 0 : i32
    %c0_i32_0 = arith.constant 0 : i32
    return %arg0, %c0_i32 : i32, i32
  }
  func.func @transform_1(%arg0: i32) -> (i32, i32) {
    %c0_i32 = arith.constant 0 : i32
    %c0_i32_0 = arith.constant 0 : i32
    %c0_i32_1 = arith.constant 0 : i32
    return %c0_i32, %c0_i32_0 : i32, i32
  }
  func.func @transform_2(%arg0: i32) -> (i32, i32) {
    %c0_i32 = arith.constant 0 : i32
    %c0_i32_0 = arith.constant 0 : i32
    %c0_i32_1 = arith.constant 0 : i32
    return %c0_i32, %c0_i32_0 : i32, i32
  }
  func.func @transform_3(%arg0: i32) -> (i32, i32) {
    %c0_i32 = arith.constant 0 : i32
    %c0_i32_0 = arith.constant 0 : i32
    %c0_i32_1 = arith.constant 0 : i32
    return %c0_i32, %c0_i32_0 : i32, i32
  }
  func.func @transform_4(%arg0: i32) -> (i32, i32) {
    %c0_i32 = arith.constant 0 : i32
    %c0_i32_0 = arith.constant 0 : i32
    %c0_i32_1 = arith.constant 0 : i32
    return %c0_i32, %c0_i32_0 : i32, i32
  }
  func.func @transform_5(%arg0: i32) -> (i32, i32) {
    %c0_i32 = arith.constant 0 : i32
    %c0_i32_0 = arith.constant 0 : i32
    %c0_i32_1 = arith.constant 0 : i32
    return %c0_i32, %c0_i32_0 : i32, i32
  }
  func.func @transform_6(%arg0: i32) -> (i32, i32) {
    %c0_i32 = arith.constant 0 : i32
    %c0_i32_0 = arith.constant 0 : i32
    %c0_i32_1 = arith.constant 0 : i32
    return %c0_i32, %c0_i32_0 : i32, i32
  }
  func.func @transform_7(%arg0: i32) -> (i32, i32) {
    %c0_i32 = arith.constant 0 : i32
    %c0_i32_0 = arith.constant 0 : i32
    return %c0_i32, %arg0 : i32, i32
  }
}

</mosaic_0001>

<bundles_post_ra>
// kernel: tpu_custom_call.1
= control target key start
LH: loop header
LB: loop body
LE: loop exit
PB: predicated region body
PF: predicated region fallthrough
CT: control target
= control target key end

     0   :  { %vm82_vm0 = vcmask 31744   ;;  %v673_v6 = vmov 0   ;;  %s879_s0 = inlined_call_operand.vmem [shape: f32[8,4], index: 0, kind: input, shape index: {}]   ;;  %s880_s1 = inlined_call_operand.vmem [shape: f32[32,4], index: 1, kind: input, shape index: {}]   ;;  %s881_s2 = inlined_call_operand.vmem [shape: f32[32,1], index: 2, kind: input, shape index: {}]   ;;  %s882_s3 = inlined_call_operand.vmem [shape: f32[32,32], index: 3, kind: input, shape index: {}]   ;;  %s883_s4 = inlined_call_operand.vmem [shape: f32[32,1], index: 4, kind: input, shape index: {}]   ;;  %s884_s5 = inlined_call_operand.vmem [shape: f32[1,32], index: 5, kind: input, shape index: {}]   ;;  %s885_s6 = inlined_call_operand.<no memory space> [shape: f32[1,1], index: 6, kind: input, shape index: {}]   ;;  %s886_s7 = inlined_call_operand.hbm [shape: f32[1,8], index: 7, kind: output, shape index: {}]  }
   0x1   :  { %v46_v0 = vld [vmem:[%s879_s0] sm:$0xff]  ;;  %v47_v1 = vld [vmem:[%s879_s0 + $0x8] sm:$0xff]  ;;  %v48_v2 = vld [vmem:[%s879_s0 + $0x10] sm:$0xff]  ;;  %631 = vset.pattern.permute.xlu0 %v673_v6  ;;  %632 = vset.pattern.permute.xlu1 %v673_v6 }
   0x2   :  { %v564_v3 = vpack.c.bf16 %v47_v1, %v46_v0  ;;  %vm729_vm1 = vmpackc.low %vm82_vm0, %vm82_vm0  ;;  %v49_v5 = vld [vmem:[%s879_s0 + $0x18] sm:$0xff]  ;;  %v28_v8 = vld [vmem:[%s880_s1] sm:$0xff] }
   0x3   :  { %v570_v7 = vpack.c.bf16 %v49_v5, %v48_v2  ;;  %v50_v9 = vld [vmem:[%s879_s0 + $0x20] sm:$0xff]  ;;  %v51_v10 = vld [vmem:[%s879_s0 + $0x28] sm:$0xff]  ;;  %533 = vmatprep.mubr.msk.f32.mxu0 %vm82_vm0, %v28_v8  ;;  %v39_v12 = vld [vmem:[%s881_s2 + $0x10] sm:$0xff] }
   0x4   :  { %566 = vmatprep.subr.msk.bf16.mxu0 %vm729_vm1, %v564_v3  ;;  %v37_v11 = vld [vmem:[%s881_s2] sm:$0xff]  ;;  %74 = vperm.xlu1 %632, %v39_v12   ;;  %v576_v13 = vpack.c.bf16 %v51_v10, %v50_v9  ;;  %v38_v14 = vld [vmem:[%s881_s2 + $0x8] sm:$0xff] }
   0x5   :  { %569 = vmatpush3.bf16.xpose.msk.msra.mxu0 %vm729_vm1, %v564_v3  ;;  %64 = vperm.xlu0 %631, %v37_v11  }
   0x6   :  { %572 = vmatprep.subr.msk.bf16.mxu0 %vm729_vm1, %v570_v7 }
   0x7   :  { %13 = vsyncpa [#allocation4], 0  ;;  %v40_v15 = vld [vmem:[%s881_s2 + $0x18] sm:$0xff]  ;;  %v41_v16 = vld [vmem:[%s883_s4] sm:$0xff]  ;;  %vm252_vm2 = vcmask 261120   ;;  %v674_v60 = vmov 0.0|0.0  }
   0x8   :  { %79 = vperm.xlu1 %632, %v40_v15   ;;  %v52_v17 = vld [vmem:[%s879_s0 + $0x30] sm:$0xff]  ;;  %v53_v18 = vld [vmem:[%s879_s0 + $0x38] sm:$0xff]  ;;  %v42_v19 = vld [vmem:[%s883_s4 + $0x8] sm:$0xff]  ;;  %vm675_vm3 = vmmov 0   ;;  %v676_v61 = vmov 0.0   ;;  %s677_s16 = smov [#allocation3]  }
   0x9   :  { %69 = vperm.xlu0 %631, %v38_v14   ;;  %v582_v20 = vpack.c.bf16 %v53_v18, %v52_v17  ;;  %v43_v21 = vld [vmem:[%s883_s4 + $0x10] sm:$0xff]  ;;  %v44_v22 = vld [vmem:[%s883_s4 + $0x18] sm:$0xff]  ;;  %v54_v23 = vld [vmem:[%s879_s0 + $0x40] sm:$0xff]  ;;  %v354_v17 = vstv %s885_s6  ;;  %s435_s17 = sshll.u32 %s677_s16, 4  ;;  %s436_s17 = int_to_ptr.vmem [resolvable:$true] %s435_s17 }
   0xa   :  { %v55_v24 = vld [vmem:[%s879_s0 + $0x48] sm:$0xff]  ;;  %v56_v26 = vld [vmem:[%s879_s0 + $0x50] sm:$0xff]  ;;  %v57_v27 = vld [vmem:[%s879_s0 + $0x58] sm:$0xff]  ;;  %s649_s18 = scalar_lea.vmem %s436_s17, 16  ;;  %s653_s19 = scalar_lea.vmem %s436_s17, 32 }
   0xb   :  { %v588_v25 = vpack.c.bf16 %v55_v24, %v54_v23  ;;  %v594_v28 = vpack.c.bf16 %v57_v27, %v56_v26  ;;  %v58_v29 = vld [vmem:[%s879_s0 + $0x60] sm:$0xff]  ;;  %v59_v30 = vld [vmem:[%s879_s0 + $0x68] sm:$0xff]  ;;  %v60_v32 = vld [vmem:[%s879_s0 + $0x70] sm:$0xff]  ;;  %p650_p0 = scmp.ne.s32.totalorder %s436_s17, %s649_s18  ;;  %p654_p1 = scmp.lt.s32.totalorder %s436_s17, %s436_s17 }
   0xc   :  { %239 = vperm.xlu1 %632, %v42_v19   ;;  %v600_v31 = vpack.c.bf16 %v59_v30, %v58_v29  ;;  %v61_v33 = vld [vmem:[%s879_s0 + $0x78] sm:$0xff]  ;;  %v29_v35 = vld [vmem:[%s880_s1 + $0x8] sm:$0xff]  ;;  %v30_v36 = vld [vmem:[%s880_s1 + $0x10] sm:$0xff]  ;;  %p655_p2 = scmp.lt.s32.totalorder %s653_s19, %s649_s18 }
   0xd   :  { %575 = vmatpush3.bf16.xpose.msk.msra.mxu0 %vm729_vm1, %v570_v7  ;;  %234 = vperm.xlu0 %631, %v41_v16   ;;  %v606_v34 = vpack.c.bf16 %v61_v33, %v60_v32  ;;  %v31_v37 = vld [vmem:[%s880_s1 + $0x18] sm:$0xff]  ;;  %v32_v38 = vld [vmem:[%s882_s3] sm:$0xff]  ;;  %v33_v57 = vld [vmem:[%s882_s3 + $0x8] sm:$0xff] }
   0xe   :  { %578 = vmatprep.subr.msk.bf16.mxu0 %vm729_vm1, %v576_v13  ;;  %547 = vmatprep.mubr.msk.f32.mxu1 %vm252_vm2, %v32_v38  ;;  %v34_v58 = vld [vmem:[%s882_s3 + $0x10] sm:$0xff]  ;;  %v35_v59 = vld [vmem:[%s882_s3 + $0x18] sm:$0xff]  ;;  %v36_v16 = vld [vmem:[%s884_s5] sm:$0x1]  ;;  %p656_p3 = por %p655_p2, %p654_p1 }
  0x10   :  { %249 = vperm.xlu1 %632, %v44_v22   ;;  %p657_p4 = pnand %p656_p3, %p650_p0 }
  0x11   :  { %244 = vperm.xlu0 %631, %v43_v21  }
  0x15   :  { %581 = vmatpush3.bf16.xpose.msk.msra.mxu0 %vm729_vm1, %v576_v13 }
  0x16   :  { %584 = vmatprep.subr.msk.bf16.mxu0 %vm729_vm1, %v582_v20 }
  0x1d   :  { %587 = vmatpush3.bf16.xpose.msk.msra.mxu0 %vm729_vm1, %v582_v20 }
  0x1e   :  { %590 = vmatprep.subr.msk.bf16.mxu0 %vm729_vm1, %v588_v25 }
  0x25   :  { %593 = vmatpush3.bf16.xpose.msk.msra.mxu0 %vm729_vm1, %v588_v25 }
  0x26   :  { %596 = vmatprep.subr.msk.bf16.mxu0 %vm729_vm1, %v594_v28 }
  0x2d   :  { %599 = vmatpush3.bf16.xpose.msk.msra.mxu0 %vm729_vm1, %v594_v28 }
  0x2e   :  { %602 = vmatprep.subr.msk.bf16.mxu0 %vm729_vm1, %v600_v31 }
  0x35   :  { %605 = vmatpush3.bf16.xpose.msk.msra.mxu0 %vm729_vm1, %v600_v31 }
  0x36   :  { %608 = vmatprep.subr.msk.bf16.mxu0 %vm729_vm1, %v606_v34 }
  0x3d   :  { %611 = vmatpush3.bf16.xpose.msk.msra.mxu0 %vm729_vm1, %v606_v34 }
  0x44   :  { %534 = vmatmul.mubr.msk.f32.vlgmr.msra.gmra.mrb[0].mxu0 %vm82_vm0, %v29_v35 }
  0x45   :  { %536 = vmatprep.mubr.msk.f32.mxu0 %vm82_vm0, %v30_v36 }
  0x48   :  { %537 = vmatmul.mubr.msk.f32.gmra.mrb[2].mxu0 %vm82_vm0, %v31_v37 }
  0x83   :  { %v75_v40 = vpop.permute.xlu1 %74 }
  0x84   :  { %v65_v39 = vpop.permute.xlu0 %64 }
  0x87   :  { %v80_v46 = vpop.permute.xlu1 %79 }
  0x88   :  { %v70_v41 = vpop.permute.xlu0 %69 }
  0x8b   :  { %v240_v62 = vpop.permute.xlu1 %239 }
  0x8c   :  { %v235_v63 = vpop.permute.xlu0 %234 }
  0x8f   :  { %v250_v4 = vpop.permute.xlu1 %249 }
  0x90   :  { %v245_v6 = vpop.permute.xlu0 %244 }
 0x117   :  { %v535_v42 = vpop.f32.mrb[0].mxu0 }
 0x118   :  { %v215_v43 = vadd.f32 %v535_v42, %v70_v41  ;;  %v209_v44 = vpop.f32.mrb[1].mxu0 }
 0x119   :  { %v210_v45 = vadd.f32 %v209_v44, %v65_v39 }
 0x11a   :  { %633 = vtanh.f32 %v215_v43 }
 0x11b   :  { %635 = vtanh.f32 %v210_v45  ;;  %v538_v47 = vpop.f32.mrb[2].mxu0 }
 0x11c   :  { %v225_v48 = vadd.f32 %v538_v47, %v80_v46  ;;  %v219_v49 = vpop.f32.mrb[3].mxu0 }
 0x11d   :  { %v220_v50 = vadd.f32 %v219_v49, %v75_v40 }
 0x11e   :  { %637 = vtanh.f32 %v225_v48 }
 0x11f   :  { %639 = vtanh.f32 %v220_v50 }
 0x124   :  { %v634_v51 = vpop.eup %633 }
 0x125   :  { %v636_v52 = vpop.eup %635 }
 0x126   :  { %v612_v53 = vpack.c.bf16 %v634_v51, %v636_v52 }
 0x128   :  { %v638_v54 = vpop.eup %637  ;;  %613 = vmatprep.subr.bf16.mxu1 %v612_v53 }
 0x129   :  { %v640_v55 = vpop.eup %639  ;;  %615 = vmatpush3.bf16.msra.mxu1 %v612_v53 }
 0x12a   :  { %v616_v56 = vpack.c.bf16 %v638_v54, %v640_v55 }
 0x12c   :  { %617 = vmatprep.subr.bf16.mxu1 %v616_v56 }
 0x12d   :  { %619 = vmatpush3.bf16.msra.mxu1 %v616_v56 }
 0x12e   :  { %620 = vmatprep.subr.bf16.mxu1 %v674_v60 }
 0x130   :  { %548 = vmatmul.mubr.msk.f32.vlgmr.msra.gmra.mrb[0].mxu1 %vm252_vm2, %v33_v57 }
 0x131   :  { %550 = vmatprep.mubr.msk.f32.mxu1 %vm252_vm2, %v34_v58 }
 0x134   :  { %551 = vmatmul.mubr.msk.f32.gmra.mrb[2].mxu1 %vm252_vm2, %v35_v59 }
 0x135   :  { %561 = vmatprep.mubr.msk.f32.mxu1 %vm675_vm3, %v676_v61 }
 0x203   :  { %v549_v0 = vpop.f32.mrb[0].mxu1 }
 0x204   :  { %v337_v1 = vadd.f32 %v549_v0, %v240_v62  ;;  %v331_v2 = vpop.f32.mrb[1].mxu1 }
 0x205   :  { %v332_v3 = vadd.f32 %v331_v2, %v235_v63 }
 0x206   :  { %641 = vtanh.f32 %v337_v1 }
 0x207   :  { %643 = vtanh.f32 %v332_v3  ;;  %v552_v5 = vpop.f32.mrb[2].mxu1 }
 0x208   :  { %v347_v7 = vadd.f32 %v552_v5, %v250_v4  ;;  %v341_v8 = vpop.f32.mrb[3].mxu1 }
 0x209   :  { %v342_v9 = vadd.f32 %v341_v8, %v245_v6 }
 0x20a   :  { %645 = vtanh.f32 %v347_v7 }
 0x20b   :  { %647 = vtanh.f32 %v342_v9 }
 0x210   :  { %v642_v10 = vpop.eup %641 }
 0x211   :  { %v644_v11 = vpop.eup %643 }
 0x212   :  { %v621_v12 = vpack.c.bf16 %v642_v10, %v644_v11 }
 0x214   :  { %v646_v13 = vpop.eup %645  ;;  %622 = vmatpush3.bf16.msra.mxu1 %v621_v12 }
 0x215   :  { %v648_v14 = vpop.eup %647  ;;  %623 = vmatprep.subr.bf16.mxu1 %v674_v60 }
 0x216   :  { %v624_v15 = vpack.c.bf16 %v646_v13, %v648_v14 }
 0x218   :  { %625 = vmatpush3.bf16.msra.mxu1 %v624_v15 }
 0x21b   :  { %562 = vmatmul.mubr.msk.f32.vlgmr.msra.gmra.mrb[4].mxu1 %vm252_vm2, %v36_v16 }
 0x2ee   :  { %v424_v18 = vpop.f32.mrb[4].mxu1 }
 0x2ef   :  { %v425_v19 = vadd.f32 %v424_v18, %v354_v17  ;;  %v563_v20 = vpop.f32.mrb[5].mxu1 }
 0x2f1   :  { %428 = vst [vmem:[#allocation3] sm:$0x1] %v425_v19 }
 0x2f2   :  { %660 = shalt.err (!%p657_p4)
}
 0x2f3   :  { %s661_s21 = scalar_lea.hbm %s886_s7, 16 }
 0x2f4   :  { %p662_p5 = scmp.ne.s32.totalorder %s886_s7, %s661_s21  ;;  %p665_p6 = scmp.lt.u32.totalorder %s661_s21, %s886_s7 }
 0x2f6   :  { %p667_p7 = pnand %p665_p6, %p662_p5 }
 0x2f8   :  { %670 = shalt.err (!%p667_p7)
}
 0x2f9   :  { %438 = dma.vmem_to_hbm [thread:$0]  %s436_s17, 16, %s886_s7, [#allocation4]  }
 0x2fa   :  { %671 = dma.done.wait [#allocation4], 16  }
 0x2fb   :  { %672 = vsyncadd [#allocation4], 4294967280 }
 0x2fc   :  { %442 = vsyncpa [#allocation4], 1 }

</bundles_post_ra>
